<compile_context>
chip_gen: v7x
topology: tpu7x:2x2x1
jax: 0.10.0
libtpu: 0.0.40
codegen_flags: <defaults>
</compile_context>

<pallas_src>
import functools

import jax
import jax.numpy as jnp
from jax.experimental import pallas as pl
from jax.experimental.pallas import tpu as pltpu

_LANES = 128
_SUBLANES = 8


def _round_up(x: int, m: int) -> int:
    return ((x + m - 1) // m) * m


def _flops_partial_kernel(action_ref, flops_ref, out_ref, *, batch, block_b,
                          needs_mask):
    """One grid step: partial weighted sum over `block_b` batch rows.

    action_ref: (block_b, S) input dtype, VMEM
    flops_ref : (1, S) f32, VMEM (resident across the grid)
    out_ref   : (1, 8, 128) f32, VMEM -- partial sum splatted across the tile
    """
    a = action_ref[...].astype(jnp.float32)              # upcast per-tile
    if needs_mask:
        i = pl.program_id(0)
        rows = jax.lax.broadcasted_iota(jnp.int32, a.shape, 0)
        valid = rows < (batch - i * block_b)              # rows past B are padding
        a = jnp.where(valid, a, 0.0)
    # Batch-sum first (cheap row reduction), weight last (15 mults per block).
    col_sums = jnp.sum(a, axis=0, keepdims=True)          # (1, S)
    partial = jnp.sum(col_sums * flops_ref[...])          # scalar partial
    # Splat into a full hardware tile -> unmasked, aligned store.
    out_ref[...] = jnp.broadcast_to(partial, out_ref.shape)


def flops_loss(action: jax.Array, flops_vector: jax.Array, *,
               block_b: int = 1024) -> jax.Array:
    """action: (B, S) float (any float dtype), flops_vector: (S,) -> scalar f32."""
    B, S = action.shape
    # Batch block: multiple of 32 (covers f32/bf16/int8 sublane packing) and
    # never (much) larger than the batch itself.
    block_b = min(_round_up(block_b, 32), _round_up(B, 32))
    nb = pl.cdiv(B, block_b)
    needs_mask = (B % block_b) != 0

    flops_row = jnp.asarray(flops_vector, jnp.float32).reshape(1, S)

    kernel = functools.partial(
        _flops_partial_kernel, batch=B, block_b=block_b, needs_mask=needs_mask)

    partial_tiles = pl.pallas_call(
        kernel,
        out_shape=jax.ShapeDtypeStruct((nb, _SUBLANES, _LANES), jnp.float32),
        grid=(nb,),
        in_specs=[
            pl.BlockSpec((block_b, S), lambda i: (i, 0)),     # batch tile
            pl.BlockSpec((1, S), lambda i: (0, 0)),           # flops row (resident)
        ],
        out_specs=pl.BlockSpec((1, _SUBLANES, _LANES), lambda i: (i, 0, 0)),
        compiler_params=pltpu.CompilerParams(
            dimension_semantics=("parallel",),      # independent per-block partials
            vmem_limit_bytes=16 * 1024 * 1024,      # ~1 MiB actually used; safe on all chips
        ),
    )(action, flops_row)

    # Tiny final reduction over num_blocks partials + mean normalization.
    partials = partial_tiles[:, 0, 0]                     # (nb,)
    return jnp.sum(partials) / jnp.float32(B)


if __name__ == "__main__":
    # Fixed FLOPs constants from the PyTorch module __init__ (length 15).
    FLOPS_VECTOR = jnp.array(
        [0.43, 0.43, 0.43, 0.43, 0.68, 0.68, 1.18,
         0.31, 0.31, 0.31, 0.31, 0.43, 0.43, 0.68, 0.18],
        dtype=jnp.float32,
    )
    S = FLOPS_VECTOR.shape[0]

    def _ref(a):
        return jnp.mean(jnp.einsum("bs,s->b", a.astype(jnp.float32), FLOPS_VECTOR))

    key = jax.random.PRNGKey(0)

    # Module-implied small case: batch=2, seq=15, f32.
    action = jax.random.uniform(key, (2, S), dtype=jnp.float32)
    result = jax.block_until_ready(flops_loss(action, FLOPS_VECTOR))
    assert jnp.allclose(result, _ref(action), rtol=1e-5, atol=1e-6), (
        result, _ref(action))

    # Exercise the tiled / parallel path: several grid steps, no tail mask.
    k1, k2 = jax.random.split(key)
    action_f32 = jax.random.uniform(k1, (96, S), dtype=jnp.float32)
    r = jax.block_until_ready(flops_loss(action_f32, FLOPS_VECTOR, block_b=32))
    assert jnp.allclose(r, _ref(action_f32), rtol=1e-5, atol=1e-6), (
        r, _ref(action_f32))

    # Exercise the ragged-tail mask + in-kernel bf16 upcast.
    action_bf16 = jax.random.uniform(k2, (50, S), dtype=jnp.float32).astype(
        jnp.bfloat16)
    r = jax.block_until_ready(flops_loss(action_bf16, FLOPS_VECTOR, block_b=32))
    assert jnp.allclose(r, _ref(action_bf16), rtol=1e-5, atol=1e-5), (
        r, _ref(action_bf16))

    print("KERNEL_OK")
</pallas_src>

<mosaic_0001>
module attributes {stable_mosaic.version = 11 : i64} {
  func.func @_flops_partial_kernel(%arg0: i32, %arg1: memref<32x15xf32, #tpu.memory_space<vmem>>, %arg2: memref<1x15xf32, #tpu.memory_space<vmem>>, %arg3: memref<1x8x128xf32, #tpu.memory_space<vmem>>) attributes {dimension_semantics = [#tpu.dimension_semantics<parallel>], iteration_bounds = array<i64: 1>, scalar_prefetch = 0 : i64, scratch_operands = 0 : i64, tpu.core_type = #tpu.core_type<tc>, window_params = [{transform_indices = @transform_0, window_bounds = array<i64: 32, 15>}, {pipeline_mode = #tpu.pipeline_mode<synchronous>, transform_indices = @transform_1, window_bounds = array<i64: 1, 15>}, {transform_indices = @transform_2, window_bounds = array<i64: 1, 8, 128>}]} {
    %c0 = arith.constant 0 : index
    %c0_0 = arith.constant 0 : index
    %0 = vector.load %arg1[%c0, %c0_0] : memref<32x15xf32, #tpu.memory_space<vmem>>, vector<32x15xf32>
    %1 = tpu.iota {dimensions = array<i32: 0>} : vector<32x15xi32>
    %c32_i32 = arith.constant 32 : i32
    %2 = arith.muli %arg0, %c32_i32 : i32
    %c2_i32 = arith.constant 2 : i32
    %3 = arith.subi %c2_i32, %2 : i32
    %4 = vector.broadcast %3 : i32 to vector<32x15xi32>
    %5 = arith.cmpi slt, %1, %4 : vector<32x15xi32>
    %cst = arith.constant 0.000000e+00 : f32
    %6 = vector.broadcast %cst : f32 to vector<32x15xf32>
    %7 = arith.select %5, %0, %6 : vector<32x15xi1>, vector<32x15xf32>
    %cst_1 = arith.constant dense<0.000000e+00> : vector<15xf32>
    %8 = vector.multi_reduction <add>, %7, %cst_1 [0] : vector<32x15xf32> to vector<15xf32>
    %9 = vector.shape_cast %8 : vector<15xf32> to vector<1x15xf32>
    %c0_2 = arith.constant 0 : index
    %c0_3 = arith.constant 0 : index
    %10 = vector.load %arg2[%c0_2, %c0_3] : memref<1x15xf32, #tpu.memory_space<vmem>>, vector<1x15xf32>
    %11 = arith.mulf %9, %10 : vector<1x15xf32>
    %12 = vector.shape_cast %11 : vector<1x15xf32> to vector<1x1x15xf32>
    %cst_4 = arith.constant dense<0.000000e+00> : vector<1xf32>
    %13 = vector.multi_reduction <add>, %12, %cst_4 [1, 2] : vector<1x1x15xf32> to vector<1xf32>
    %14 = vector.shape_cast %13 : vector<1xf32> to vector<1x1x1xf32>
    %15 = vector.extract %14[0, 0, 0] : f32 from vector<1x1x1xf32>
    %16 = vector.broadcast %15 : f32 to vector<1x8x128xf32>
    %c0_5 = arith.constant 0 : index
    %c0_6 = arith.constant 0 : index
    %c0_7 = arith.constant 0 : index
    %17 = vector.load %arg3[%c0_5, %c0_6, %c0_7] : memref<1x8x128xf32, #tpu.memory_space<vmem>>, vector<1x8x128xf32>
    tpu.vector_store %arg3[%c0_5, %c0_6, %c0_7], %16 {strides = array<i32>} : memref<1x8x128xf32, #tpu.memory_space<vmem>>, vector<1x8x128xf32>,
    return
  }
  func.func @transform_0(%arg0: i32) -> (i32, i32) {
    %c0_i32 = arith.constant 0 : i32
    %c0_i32_0 = arith.constant 0 : i32
    return %arg0, %c0_i32 : i32, i32
  }
  func.func @transform_1(%arg0: i32) -> (i32, i32) {
    %c0_i32 = arith.constant 0 : i32
    %c0_i32_0 = arith.constant 0 : i32
    %c0_i32_1 = arith.constant 0 : i32
    return %c0_i32, %c0_i32_0 : i32, i32
  }
  func.func @transform_2(%arg0: i32) -> (i32, i32, i32) {
    %c0_i32 = arith.constant 0 : i32
    %c0_i32_0 = arith.constant 0 : i32
    %c0_i32_1 = arith.constant 0 : i32
    return %arg0, %c0_i32, %c0_i32_0 : i32, i32, i32
  }
}

</mosaic_0001>

<bundles_post_ra>
// kernel: tpu_custom_call.1
= control target key start
LH: loop header
LB: loop body
LE: loop exit
PB: predicated region body
PF: predicated region fallthrough
CT: control target
= control target key end

     0   :  { %7 = vsyncpa [#allocation3], 0  ;;  %s191_s0 = inlined_call_operand.hbm [shape: f32[2,15], index: 0, kind: input, shape index: {}]   ;;  %s192_s1 = inlined_call_operand.vmem [shape: f32[1,15], index: 1, kind: input, shape index: {}]   ;;  %s193_s2 = inlined_call_operand.hbm [shape: f32[1,8,128], index: 2, kind: output, shape index: {}]  }
   0x1   :  { %8 = vsyncpa [#allocation4], 0 }
   0x2   :  { %13 = vsyncadd [#allocation3], 480  ;;  %s145_s9 = smov [#allocation2]   ;;  %s97_s13 = scalar_lea.hbm %s191_s0, 32 }
   0x3   :  { %s14_s10 = sshll.u32 %s145_s9, 4  ;;  %p98_p0 = scmp.ne.s32.totalorder %s191_s0, %s97_s13  ;;  %s15_s10 = int_to_ptr.vmem [resolvable:$true] %s14_s10 }
   0x4   :  { %p101_p1 = scmp.lt.u32.totalorder %s97_s13, %s191_s0 }
   0x6   :  { %p103_p2 = pnand %p101_p1, %p98_p0 }
   0x8   :  { %106 = shalt.err (!%p103_p2)
}
   0x9   :  { %s107_s18 = scalar_lea.vmem %s15_s10, 32  ;;  %s111_s19 = scalar_lea.vmem %s15_s10, 512 }
   0xa   :  { %p108_p3 = scmp.ne.s32.totalorder %s15_s10, %s107_s18  ;;  %p112_p4 = scmp.lt.s32.totalorder %s15_s10, %s15_s10 }
   0xb   :  { %p113_p5 = scmp.lt.s32.totalorder %s111_s19, %s107_s18 }
   0xd   :  { %p114_p6 = por %p113_p5, %p112_p4 }
   0xf   :  { %p115_p7 = pnand %p114_p6, %p108_p3 }
  0x11   :  { %118 = shalt.err (!%p115_p7)
}
  0x12   :  { %s146_s20 = smov 32   ;;  %s147_s21 = smov 2  }
  0x13   :  { %20 = dma.hbm_to_vmem [thread:$0]  %s191_s0, 32, %s15_s10, [#allocation3], %s146_s20, %s146_s20, %s147_s21  }
  0x14   :  { %141 = dma.done.wait [#allocation3], 512  }
  0x15   :  { %142 = vsyncadd [#allocation3], 4294966784  ;;  %vm46_vm0 = vcmask 121856   ;;  %v90_v0 = vld [vmem:[#allocation2] sm:$0x3]  ;;  %vm62_vm1 = vcmask 114688  }
  0x16   :  { %v47_v1 = vsel %vm46_vm0, %v90_v0, 0.0  ;;  %v60_v7 = vld [vmem:[%s192_s1] sm:$0x1]  ;;  %s148_s0 = smov [#allocation5]  }
  0x17   :  { %v54_v2 = vrot.slane %v47_v1, 4  ;;  %s81_s26 = sshll.u32 %s148_s0, 4  ;;  %s82_s26 = int_to_ptr.vmem [resolvable:$true] %s81_s26 }
  0x18   :  { %s119_s1 = scalar_lea.vmem %s82_s26, 128  ;;  %p124_p9 = scmp.lt.s32.totalorder %s82_s26, %s82_s26 }
  0x19   :  { %v55_v3 = vadd.f32 %v54_v2, %v47_v1  ;;  %p120_p8 = scmp.ne.s32.totalorder %s82_s26, %s119_s1  ;;  %p125_p10 = scmp.lt.s32.totalorder %s119_s1, %s119_s1 }
  0x1b   :  { %v56_v4 = vrot.slane %v55_v3, 2  ;;  %p126_p11 = por %p125_p10, %p124_p9 }
  0x1d   :  { %v57_v5 = vadd.f32 %v56_v4, %v55_v3  ;;  %p127_p12 = pnand %p126_p11, %p120_p8 }
  0x1f   :  { %v58_v6 = vrot.slane %v57_v5, 1 }
  0x21   :  { %v59_v8 = vadd.f32 %v58_v6, %v57_v5 }
  0x23   :  { %v61_v9 = vmul.f32 %v60_v7, %v59_v8 }
  0x25   :  { %v63_v10 = vsel %vm62_vm1, %v61_v9, 0.0 }
  0x26   :  { %64 = vadd.xlane.f32.xlu0 %v63_v10 }
  0xb3   :  { %v65_v11 = vpop.xlane.xlu0 %64 }
  0xb4   :  { %v66_v12 = vrot.slane %v65_v11, 4 }
  0xb6   :  { %v67_v13 = vadd.f32 %v66_v12, %v65_v11 }
  0xb8   :  { %v68_v14 = vrot.slane %v67_v13, 2 }
  0xba   :  { %v69_v15 = vadd.f32 %v68_v14, %v67_v13 }
  0xbc   :  { %v70_v16 = vrot.slane %v69_v15, 1 }
  0xbe   :  { %v71_v17 = vadd.f32 %v70_v16, %v69_v15 }
  0xc0   :  { %91 = vpush %v71_v17 }
  0xf1   :  { %s92_s27 = spop %91 }
  0xf2   :  { %v73_v18 = vstv %s92_s27 }
  0xf3   :  { %74 = vst [vmem:[#allocation5] sm:$0xff] %v73_v18 }
  0xf4   :  { %130 = shalt.err (!%p127_p12)
}
  0xf5   :  { %s131_s30 = scalar_lea.hbm %s193_s2, 128 }
  0xf6   :  { %p132_p13 = scmp.ne.s32.totalorder %s193_s2, %s131_s30  ;;  %p135_p0 = scmp.lt.u32.totalorder %s131_s30, %s193_s2 }
  0xf8   :  { %p137_p1 = pnand %p135_p0, %p132_p13 }
  0xfa   :  { %140 = shalt.err (!%p137_p1)
}
  0xfb   :  { %84 = dma.vmem_to_hbm [thread:$0]  %s82_s26, 128, %s193_s2, [#allocation4]  }
  0xfc   :  { %143 = dma.done.wait [#allocation4], 128  }
  0xfd   :  { %144 = vsyncadd [#allocation4], 4294967168 }
  0xfe   :  { %88 = vsyncpa [#allocation3], 1 }
  0xff   :  { %89 = vsyncpa [#allocation4], 1 }

</bundles_post_ra>
